<compile_context>
chip_gen: v5e
topology: v5e:2x2
jax: 0.10.0
libtpu: 0.0.40
codegen_flags: <defaults>
</compile_context>

<pallas_src>
import jax
import jax.numpy as jnp
from jax.experimental import pallas as pl
from jax.experimental.pallas import tpu as pltpu

EPS = 1e-10


def _l2norm_kernel(x_ref, o_ref):
    # Squared-sum reduction over the lane (feature) axis + normalize, in f32.
    x = x_ref[...].astype(jnp.float32)
    ss = jnp.sum(x * x, axis=1, keepdims=True)        # (tb, 1)
    inv = jax.lax.rsqrt(ss + EPS)                     # EUP rsqrt; no divide
    # TODO(synk): if a v7x bundle dump ever shows the XLU lane-reduction (not
    # DMA) as the binding slot, switch the row-sum to an MXU dot with a ones
    # block; verify-first, so keep the simple XLU reduce here.
    o_ref[...] = (x * inv).astype(o_ref.dtype)


def _round_up(n: int, m: int) -> int:
    return ((n + m - 1) // m) * m


def l2norm(x: jax.Array, *, target_block_bytes: int = 4 << 20,
           vmem_limit_cap_bytes: int = 48 << 20) -> jax.Array:
    """L2-normalize each row of a (B, D) array, matching the PyTorch L2Norm."""
    assert x.ndim == 2, "l2norm expects (B, D) descriptors (normalize dim=1)"
    B, D = x.shape
    itemsize = x.dtype.itemsize

    # Sublane alignment follows dtype packing: f32 -> 8, bf16 -> 16, int8 -> 32.
    sublane = max(8, 32 // max(1, itemsize))

    # Per-row VMEM footprint: double-buffered input + output blocks plus ~3
    # f32-block-sized compute temporaries (x_f32, x*x, x*inv), conservative.
    row_io_bytes = D * itemsize
    row_f32_bytes = D * 4
    vmem_per_row = 4 * row_io_bytes + 3 * row_f32_bytes

    # Biggest row tile that meets the byte target and stays inside the budget.
    tb_cap = max(sublane, target_block_bytes // row_io_bytes)
    tb_cap = min(tb_cap,
                 max(sublane, int(vmem_limit_cap_bytes * 0.8) // vmem_per_row))

    # Number of row blocks: respect tb_cap; for v7x megacore make it >= 2 (and
    # even) whenever B has enough rows so both TensorCores stay busy.
    n_blocks = pl.cdiv(B, tb_cap)
    if B > 2 * sublane:
        n_blocks = max(n_blocks, 2)
    if n_blocks > 1 and n_blocks % 2:
        n_blocks += 1

    tb = _round_up(pl.cdiv(B, n_blocks), sublane)
    grid = pl.cdiv(B, tb)   # ragged last block handled by Pallas; no pad/slice

    # Scoped-VMEM limit sized to the actual buffers (+25% headroom), floored at
    # 16 MiB and capped so it fits v7x's 64 MiB physical VMEM.
    vmem_limit = min(vmem_limit_cap_bytes,
                     max(int(vmem_per_row * tb * 1.25), 16 << 20))

    # Note: for best store throughput D should be a multiple of 128 (lane-dense
    # unmasked stores); other D values are still correct (masked stores).
    return pl.pallas_call(
        _l2norm_kernel,
        out_shape=jax.ShapeDtypeStruct((B, D), x.dtype),
        grid_spec=pltpu.PrefetchScalarGridSpec(
            num_scalar_prefetch=0,
            grid=(grid,),
            in_specs=[pl.BlockSpec((tb, D), lambda i: (i, 0))],
            out_specs=pl.BlockSpec((tb, D), lambda i: (i, 0)),
        ),
        compiler_params=pltpu.CompilerParams(
            dimension_semantics=("parallel",),
            vmem_limit_bytes=vmem_limit,
        ),
    )(x)


if __name__ == "__main__":
    key = jax.random.PRNGKey(0)

    def ref_l2norm(x):
        xf = x.astype(jnp.float32)
        n = jnp.sqrt(jnp.sum(xf * xf, axis=1, keepdims=True) + EPS)
        return (xf / n).astype(x.dtype)

    # Primary small test: HardNet-style descriptor batch (B, D).
    B, D = 8, 128
    x = jax.random.normal(key, (B, D), dtype=jnp.float32)
    out = jax.block_until_ready(l2norm(x))
    assert out.shape == x.shape and out.dtype == x.dtype
    assert jnp.allclose(out, ref_l2norm(x), atol=1e-6, rtol=1e-5)

    # Non-divisible batch: exercises the ragged last block (no pad / no slice)
    # and a 2-step parallel grid.
    B2, D2 = 37, 256
    x2 = jax.random.normal(jax.random.PRNGKey(1), (B2, D2), dtype=jnp.float32)
    out2 = jax.block_until_ready(l2norm(x2))
    assert out2.shape == x2.shape
    assert jnp.allclose(out2, ref_l2norm(x2), atol=1e-6, rtol=1e-5)

    # bf16 input: dtype-aware sublane alignment + f32 accumulation inside.
    B3, D3 = 24, 128
    x3 = jax.random.normal(jax.random.PRNGKey(2), (B3, D3), dtype=jnp.bfloat16)
    out3 = jax.block_until_ready(l2norm(x3))
    assert out3.shape == x3.shape and out3.dtype == x3.dtype
    assert jnp.allclose(out3.astype(jnp.float32),
                        ref_l2norm(x3).astype(jnp.float32),
                        atol=2e-2, rtol=2e-2)

    print("KERNEL_OK")
</pallas_src>

<mosaic_0001>
module attributes {stable_mosaic.version = 11 : i64} {
  func.func @_l2norm_kernel(%arg0: i32, %arg1: memref<8x128xf32, #tpu.memory_space<vmem>>, %arg2: memref<8x128xf32, #tpu.memory_space<vmem>>) attributes {dimension_semantics = [#tpu.dimension_semantics<parallel>], iteration_bounds = array<i64: 1>, scalar_prefetch = 0 : i64, scratch_operands = 0 : i64, tpu.core_type = #tpu.core_type<tc>, window_params = [{transform_indices = @transform_0, window_bounds = array<i64: 8, 128>}, {transform_indices = @transform_1, window_bounds = array<i64: 8, 128>}]} {
    %c0 = arith.constant 0 : index
    %c0_0 = arith.constant 0 : index
    %0 = vector.load %arg1[%c0, %c0_0] : memref<8x128xf32, #tpu.memory_space<vmem>>, vector<8x128xf32>
    %1 = arith.mulf %0, %0 : vector<8x128xf32>
    %cst = arith.constant dense<0.000000e+00> : vector<8xf32>
    %2 = vector.multi_reduction <add>, %1, %cst [1] : vector<8x128xf32> to vector<8xf32>
    %3 = vector.shape_cast %2 : vector<8xf32> to vector<8x1xf32>
    %cst_1 = arith.constant 1.000000e-10 : f32
    %4 = vector.broadcast %cst_1 : f32 to vector<8x1xf32>
    %5 = arith.addf %3, %4 : vector<8x1xf32>
    %6 = math.rsqrt %5 : vector<8x1xf32>
    %7 = vector.broadcast %6 : vector<8x1xf32> to vector<8x128xf32>
    %8 = arith.mulf %0, %7 : vector<8x128xf32>
    %c0_2 = arith.constant 0 : index
    %c0_3 = arith.constant 0 : index
    %9 = vector.load %arg2[%c0_2, %c0_3] : memref<8x128xf32, #tpu.memory_space<vmem>>, vector<8x128xf32>
    tpu.vector_store %arg2[%c0_2, %c0_3], %8 {strides = array<i32>} : memref<8x128xf32, #tpu.memory_space<vmem>>, vector<8x128xf32>,
    return
  }
  func.func @transform_0(%arg0: i32) -> (i32, i32) {
    %c0_i32 = arith.constant 0 : i32
    %c0_i32_0 = arith.constant 0 : i32
    return %arg0, %c0_i32 : i32, i32
  }
  func.func @transform_1(%arg0: i32) -> (i32, i32) {
    %c0_i32 = arith.constant 0 : i32
    %c0_i32_0 = arith.constant 0 : i32
    return %arg0, %c0_i32 : i32, i32
  }
}

</mosaic_0001>

<bundles_post_ra>
// kernel: tpu_custom_call.1
= control target key start
LH: loop header
LB: loop body
LE: loop exit
PB: predicated region body
PF: predicated region fallthrough
CT: control target
= control target key end

     0   :  { %6 = vsyncpa [#allocation3], 0  ;;  %s131_s0 = inlined_call_operand.hbm [shape: f32[8,128], index: 0, kind: input, shape index: {}]   ;;  %s132_s1 = inlined_call_operand.hbm [shape: f32[8,128], index: 1, kind: output, shape index: {}]  }
   0x1   :  { %7 = vsyncpa [#allocation4], 0  ;;  %s13_s8 = sshll.u32 %s131_s0, 4  ;;  %s113_s9 = smov [#allocation2]   ;;  %s14_s8 = int_to_ptr.hbm [resolvable:$true] %s13_s8 }
   0x2   :  { %s15_s10 = sshll.u32 %s113_s9, 4  ;;  %s16_s10 = int_to_ptr.vmem [resolvable:$true] %s15_s10 }
   0x3   :  { %18 = dma.hbm_to_vmem [thread:$0]  %s14_s8, 128, %s16_s10, [#allocation3]  }
   0x4   :  { %109 = dma.done.wait [#allocation3], 128  }
   0x5   :  { %110 = vsyncadd [#allocation3], 4294967168  ;;  %v23_v0 = vld [vmem:[#allocation2] sm:$0xff]  ;;  %s114_s0 = smov [#allocation5]   ;;  %s47_s14 = sshll.u32 %s132_s1, 4  ;;  %s48_s14 = int_to_ptr.hbm [resolvable:$true] %s47_s14 }
   0x6   :  { %v24_v1 = vmul.f32 %v23_v0, %v23_v0  ;;  %s45_s11 = sshll.u32 %s114_s0, 4  ;;  %s46_s11 = int_to_ptr.vmem [resolvable:$true] %s45_s11 }
   0x8   :  { %25 = vadd.xlane.f32.xlu0 %v24_v1 }
  0x7b   :  { %v26_v2 = vpop.xlane.xlu0 %25 }
  0x7c   :  { %v27_v3 = vadd.f32 1e-10, %v26_v2 }
  0x7e   :  { %59 = vrsqrt.f32 %v27_v3  ;;  %vm34_vm1 = vweird.f32 %v27_v3 }
  0x84   :  { %v60_v4 = vpop.eup %59 }
  0x85   :  { %v29_v5 = vmul.f32 %v60_v4, %v27_v3  ;;  %vm35_vm0 = vweird.f32 %v60_v4 }
  0x86   :  { %vm36_vm2 = vmor %vm34_vm1, %vm35_vm0 }
  0x87   :  { %v30_v6 = vmul.f32 %v60_v4, %v29_v5 }
  0x89   :  { %v31_v7 = vmul.f32 0.5, %v30_v6 }
  0x8b   :  { %v32_v8 = vsub.f32 1.5, %v31_v7 }
  0x8d   :  { %v33_v9 = vmul.f32 %v60_v4, %v32_v8 }
  0x8f   :  { %v37_v10 = vsel %vm36_vm2, %v60_v4, %v33_v9 }
  0x90   :  { %v38_v11 = vmul.f32 %v37_v10, %v23_v0 }
  0x92   :  { %39 = vst [vmem:[#allocation5] sm:$0xff] %v38_v11 }
  0x93   :  { %50 = dma.vmem_to_hbm [thread:$0]  %s46_s11, 128, %s48_s14, [#allocation4]  }
  0x94   :  { %111 = dma.done.wait [#allocation4], 128  }
  0x95   :  { %112 = vsyncadd [#allocation4], 4294967168 }
  0x96   :  { %55 = vsyncpa [#allocation3], 1 }
  0x97   :  { %56 = vsyncpa [#allocation4], 1 }

</bundles_post_ra>
